<compile_context>
chip_gen: v7x
topology: tpu7x:2x2x1
jax: 0.10.0
libtpu: 0.0.40
codegen_flags: <defaults>
</compile_context>

<pallas_src>
import jax
import jax.numpy as jnp
from jax.experimental import pallas as pl
from jax.experimental.pallas import tpu as pltpu


def _round_up(n, m):
    return ((n + m - 1) // m) * m


def _device_kind():
    try:
        return jax.devices()[0].device_kind.lower()
    except Exception:
        return ""


def _vmem_capacity_bytes():
    """Physical per-TensorCore VMEM: query when possible, else by generation."""
    try:
        cap = getattr(pltpu.get_tpu_info(), "vmem_capacity_bytes", None)
        if cap:
            return int(cap)
    except Exception:
        pass
    kind = _device_kind()
    if "v7" in kind:
        return 64 * 1024 * 1024
    if "v5" in kind or "v6" in kind:
        return 128 * 1024 * 1024
    return 64 * 1024 * 1024  # unknown: be conservative (v7x-safe)


def _anomalous_single_kernel(x_blk_ref, w_ref, x_full_ref, o_ref):
    """Single-pass step (full-N contraction resident in VMEM).

      x_blk_ref:  (tm, Dp)  rows i*tm.. of x
      w_ref:      (Dp, Np)  full w
      x_full_ref: (Np, Dp)  full x
      o_ref:      (tm, Dp)  output row block (f32)
    """
    t = jnp.dot(x_blk_ref[...], w_ref[...], preferred_element_type=jnp.float32)
    t = t.astype(x_blk_ref.dtype)  # no-op for f32; keeps bf16 path on the fast MXU mode
    o_ref[...] = jnp.dot(t, x_full_ref[...],
                         preferred_element_type=jnp.float32).astype(o_ref.dtype)


def _anomalous_tiled_kernel(x_blk_ref, w_blk_ref, xk_ref, o_ref):
    """One (row-block i, reduction-block k) step of out = x @ w @ x.

      x_blk_ref: (tm, Dp)  rows  i*tm.. of x
      w_blk_ref: (Dp, tk)  cols  k*tk.. of w
      xk_ref:    (tk, Dp)  rows  k*tk.. of x
      o_ref:     (tm, Dp)  f32 output row block, resident across k (accumulator)
    """
    k = pl.program_id(1)

    @pl.when(k == 0)
    def _():
        o_ref[...] = jnp.zeros_like(o_ref)

    # (tm, Dp) @ (Dp, tk) -> (tm, tk) intermediate (VMEM-staged at these sizes).
    t = jnp.dot(x_blk_ref[...], w_blk_ref[...],
                preferred_element_type=jnp.float32)
    t = t.astype(x_blk_ref.dtype)
    # (tm, tk) @ (tk, Dp) accumulated directly into the resident output block.
    o_ref[...] += jnp.dot(t, xk_ref[...], preferred_element_type=jnp.float32)


def anomalous_forward(x, w, r, *, use_bf16=False, force_tiled=False):
    """Pallas implementation of ANOMALOUSBase.forward.

    Args:
      x: (N, D) float32
      w: (D, N) float32 parameter
      r: (N, D) float32 parameter (returned as-is, matching the module)
      use_bf16: opt-in bf16 MXU feed (f32 accumulation); default off (exact f32).
      force_tiled: force the tiled-reduction path (testing / very large problems).
    Returns:
      (x @ w @ x, r)
    """
    N, D = x.shape
    assert w.shape == (D, N)

    in_dtype = jnp.bfloat16 if use_bf16 else x.dtype
    eb = jnp.dtype(in_dtype).itemsize
    out_dtype = jnp.float32  # accumulate in f32 regardless of feed dtype

    # Lane-dense output: pad D to a multiple of 128. Pad N minimally (128),
    # then choose tiles as divisors of Np (keeps quadratic padding cost low).
    Dp = _round_up(max(D, 128), 128)
    Np = _round_up(max(N, 128), 128)

    xp = x if (Np, Dp) == (N, D) else jnp.pad(x, ((0, Np - N), (0, Dp - D)))
    wp = w if (Dp, Np) == (D, N) else jnp.pad(w, ((0, Dp - D), (0, Np - N)))
    xp = xp.astype(in_dtype)
    wp = wp.astype(in_dtype)

    vmem_cap = _vmem_capacity_bytes()
    vmem_ceiling = int(0.90 * vmem_cap)   # never request more than this
    budget = int(0.85 * vmem_ceiling)     # tile-selection target (headroom)

    kind = _device_kind()
    is_v5e = ("v5" in kind) and ("lite" in kind or "v5e" in kind)

    flops = 4 * Np * Np * Dp

    # ---------------- single-pass fast path (whole problem resident) --------
    tm_s = min(128, Np)
    single_fp = (2 * tm_s * Dp * eb        # x row block (double buffered)
                 + 2 * Dp * Np * eb        # full w
                 + 2 * Np * Dp * eb        # full x
                 + 2 * tm_s * Dp * 4       # output row block
                 + tm_s * Np * 4)          # (tm_s, Np) f32 intermediate
    if (not force_tiled) and single_fp <= budget:
        cost = pl.CostEstimate(
            flops=flops,
            transcendentals=0,
            bytes_accessed=2 * Np * Dp * eb + Dp * Np * eb + Np * Dp * 4,
        )
        vmem_limit = vmem_ceiling if single_fp > 12 * 1024 * 1024 else None
        out_p = pl.pallas_call(
            _anomalous_single_kernel,
            out_shape=jax.ShapeDtypeStruct((Np, Dp), out_dtype),
            grid_spec=pltpu.PrefetchScalarGridSpec(
                num_scalar_prefetch=0,
                grid=(Np // tm_s,),
                in_specs=[
                    pl.BlockSpec((tm_s, Dp), lambda i: (i, 0)),  # x row block
                    pl.BlockSpec((Dp, Np), lambda i: (0, 0)),    # full w
                    pl.BlockSpec((Np, Dp), lambda i: (0, 0)),    # full x
                ],
                out_specs=pl.BlockSpec((tm_s, Dp), lambda i: (i, 0)),
            ),
            compiler_params=pltpu.CompilerParams(
                dimension_semantics=("parallel",),
                vmem_limit_bytes=vmem_limit,
            ),
            cost_estimate=cost,
        )(xp, wp, xp)
        return out_p[:N, :D].astype(x.dtype), r

    # ---------------- tiled-reduction path -----------------------------------
    # Reduction tile tk: match the MXU width (128 on v5e's 4x128x128 MXU,
    # 256 on v6e/v7x when it divides Np).
    if is_v5e:
        tk = 128
    else:
        tk = 256 if Np % 256 == 0 else 128
    tk = min(tk, Np)

    def footprint(tm_, tk_):
        return (2 * tm_ * Dp * eb       # x row block
                + 2 * Dp * tk_ * eb     # w column block
                + 2 * tk_ * Dp * eb     # x reduction block
                + 2 * tm_ * Dp * 4      # f32 output block
                + tm_ * tk_ * 4)        # f32 intermediate

    if tk == 256 and footprint(128, 256) > budget:
        tk = 128

    # Row tile tm: largest multiple-of-128 divisor of Np that fits the VMEM
    # budget; keep at least 2 row blocks when possible so the "parallel"
    # grid axis shards across both TensorCores on v7x.
    if Np <= 256:
        max_tm = min(Np, 128)
    else:
        max_tm = min(Np // 2, 1024)
    tm = min(128, Np)
    cand = 128
    while cand <= max_tm:
        if Np % cand == 0 and footprint(cand, tk) <= budget:
            tm = cand
        cand += 128

    grid = (Np // tm, Np // tk)
    cost = pl.CostEstimate(
        flops=flops,
        transcendentals=0,
        bytes_accessed=(grid[0] * 2 * Np * Dp * eb   # w and x re-streamed per row block
                        + Np * Dp * eb               # x row blocks (read once)
                        + Np * Dp * 4),              # output
    )
    vmem_limit = vmem_ceiling if footprint(tm, tk) > 12 * 1024 * 1024 else None

    out_p = pl.pallas_call(
        _anomalous_tiled_kernel,
        out_shape=jax.ShapeDtypeStruct((Np, Dp), out_dtype),
        grid_spec=pltpu.PrefetchScalarGridSpec(
            num_scalar_prefetch=0,
            grid=grid,
            in_specs=[
                pl.BlockSpec((tm, Dp), lambda i, k: (i, 0)),  # x row block
                pl.BlockSpec((Dp, tk), lambda i, k: (0, k)),  # w column block
                pl.BlockSpec((tk, Dp), lambda i, k: (k, 0)),  # x reduction block
            ],
            out_specs=pl.BlockSpec((tm, Dp), lambda i, k: (i, 0)),
        ),
        compiler_params=pltpu.CompilerParams(
            dimension_semantics=("parallel", "arbitrary"),
            vmem_limit_bytes=vmem_limit,
        ),
        cost_estimate=cost,
    )(xp, wp, xp)

    return out_p[:N, :D].astype(x.dtype), r


if __name__ == "__main__":
    # Shapes consistent with the module's forward: x (N, D), w (D, N), r (N, D).
    # N and D are deliberately NOT tile/lane aligned to exercise the padding path.
    N, D = 300, 100

    key = jax.random.PRNGKey(0)
    kx, kw, kr = jax.random.split(key, 3)
    x = jax.random.normal(kx, (N, D), dtype=jnp.float32)
    w = 0.02 * jax.random.normal(kw, (D, N), dtype=jnp.float32)
    r = 0.01 * jax.random.normal(kr, (N, D), dtype=jnp.float32)

    ref = (x @ w) @ x

    # Default dispatch (single-pass, fully VMEM-resident for this problem size).
    out, r_out = anomalous_forward(x, w, r)
    out = jax.block_until_ready(out)
    r_out = jax.block_until_ready(r_out)
    assert out.shape == (N, D) and r_out.shape == (N, D)
    assert jnp.allclose(out, ref, atol=5e-3, rtol=5e-3), "single-pass mismatch"
    assert jnp.array_equal(r_out, r), "r must be returned unchanged"

    # Forced tiled-reduction path: same semantics, exercises the k-accumulation.
    out_t, _ = anomalous_forward(x, w, r, force_tiled=True)
    out_t = jax.block_until_ready(out_t)
    assert jnp.allclose(out_t, ref, atol=5e-3, rtol=5e-3), "tiled mismatch"

    print("KERNEL_OK")
</pallas_src>

<mosaic_0001>
module attributes {stable_mosaic.version = 11 : i64} {
  func.func @_anomalous_single_kernel(%arg0: i32, %arg1: memref<128x128xf32, #tpu.memory_space<vmem>>, %arg2: memref<128x384xf32, #tpu.memory_space<vmem>>, %arg3: memref<384x128xf32, #tpu.memory_space<vmem>>, %arg4: memref<128x128xf32, #tpu.memory_space<vmem>>) attributes {dimension_semantics = [#tpu.dimension_semantics<parallel>], iteration_bounds = array<i64: 3>, scalar_prefetch = 0 : i64, scratch_operands = 0 : i64, tpu.core_type = #tpu.core_type<tc>, window_params = [{transform_indices = @transform_0, window_bounds = array<i64: 128, 128>}, {pipeline_mode = #tpu.pipeline_mode<synchronous>, transform_indices = @transform_1, window_bounds = array<i64: 128, 384>}, {pipeline_mode = #tpu.pipeline_mode<synchronous>, transform_indices = @transform_2, window_bounds = array<i64: 384, 128>}, {transform_indices = @transform_3, window_bounds = array<i64: 128, 128>}]} {
    %c0 = arith.constant 0 : index
    %c0_0 = arith.constant 0 : index
    %0 = vector.load %arg1[%c0, %c0_0] : memref<128x128xf32, #tpu.memory_space<vmem>>, vector<128x128xf32>
    %c0_1 = arith.constant 0 : index
    %c0_2 = arith.constant 0 : index
    %1 = vector.load %arg2[%c0_1, %c0_2] : memref<128x384xf32, #tpu.memory_space<vmem>>, vector<128x384xf32>
    %cst = arith.constant dense<0.000000e+00> : vector<128x384xf32>
    %2 = tpu.matmul %0, %1, %cst {dimension_numbers = #tpu.dot_dimension_numbers<[1], [0], [0], [1], [0, 0, 1, 1], [], []>} : vector<128x128xf32>, vector<128x384xf32>, vector<128x384xf32> -> vector<128x384xf32>
    %c0_3 = arith.constant 0 : index
    %c0_4 = arith.constant 0 : index
    %3 = vector.load %arg3[%c0_3, %c0_4] : memref<384x128xf32, #tpu.memory_space<vmem>>, vector<384x128xf32>
    %cst_5 = arith.constant dense<0.000000e+00> : vector<128x128xf32>
    %4 = tpu.matmul %2, %3, %cst_5 {dimension_numbers = #tpu.dot_dimension_numbers<[1], [0], [0], [1], [0, 0, 1, 1], [], []>} : vector<128x384xf32>, vector<384x128xf32>, vector<128x128xf32> -> vector<128x128xf32>
    %c0_6 = arith.constant 0 : index
    %c0_7 = arith.constant 0 : index
    %5 = vector.load %arg4[%c0_6, %c0_7] : memref<128x128xf32, #tpu.memory_space<vmem>>, vector<128x128xf32>
    tpu.vector_store %arg4[%c0_6, %c0_7], %4 {strides = array<i32>} : memref<128x128xf32, #tpu.memory_space<vmem>>, vector<128x128xf32>,
    return
  }
  func.func @transform_0(%arg0: i32) -> (i32, i32) {
    %c0_i32 = arith.constant 0 : i32
    %c0_i32_0 = arith.constant 0 : i32
    return %arg0, %c0_i32 : i32, i32
  }
  func.func @transform_1(%arg0: i32) -> (i32, i32) {
    %c0_i32 = arith.constant 0 : i32
    %c0_i32_0 = arith.constant 0 : i32
    %c0_i32_1 = arith.constant 0 : i32
    return %c0_i32, %c0_i32_0 : i32, i32
  }
  func.func @transform_2(%arg0: i32) -> (i32, i32) {
    %c0_i32 = arith.constant 0 : i32
    %c0_i32_0 = arith.constant 0 : i32
    %c0_i32_1 = arith.constant 0 : i32
    return %c0_i32, %c0_i32_0 : i32, i32
  }
  func.func @transform_3(%arg0: i32) -> (i32, i32) {
    %c0_i32 = arith.constant 0 : i32
    %c0_i32_0 = arith.constant 0 : i32
    return %arg0, %c0_i32 : i32, i32
  }
}

</mosaic_0001>

<bundles_post_ra>
// kernel: tpu_custom_call.1
= control target key start
LH: loop header
LB: loop body
LE: loop exit
PB: predicated region body
PF: predicated region fallthrough
CT: control target
= control target key end

     0   :  { %8 = vsyncpa [#allocation3], 0  ;;  %s2021_s0 = inlined_call_operand.hbm [shape: f32[384,128], index: 0, kind: input, shape index: {}]   ;;  %s2022_s1 = inlined_call_operand.hbm [shape: f32[128,384], index: 1, kind: input, shape index: {}]   ;;  %s2023_s2 = inlined_call_operand.hbm [shape: f32[384,128], index: 2, kind: input, shape index: {}]   ;;  %s2024_s3 = inlined_call_operand.hbm [shape: f32[384,128], index: 3, kind: output, shape index: {}]  }
   0x1   :  { %10 = vsyncpa [#allocation3 + $0x1], 0 }
   0x2   :  { %11 = vsyncpa [#allocation6], 0 }
   0x3   :  { %12 = vsyncpa [#allocation4], 0 }
   0x4   :  { %14 = vsyncpa [#allocation4 + $0x1], 0  ;;  %s1717_s12 = smov 0   ;;  %s1719_s13 = smov 0  }
   0x5   :  { %s1721_s14 = smov 0   ;;  %s1723_s15 = smov 0  }
   0x6 LB: > { %s1738_s16 = sadd.s32 4294967295, %s1684_s15   ;;  %s1050_s17 = sadd.s32 4294967294, %s1684_s15   ;;  %s1684_s15 = sphi %s1723_s15, %s2043_s15   ;;  %s1680_s14 = sphi %s1721_s14, %s2042_s14   ;;  %s1676_s13 = sphi %s1719_s13, %s2041_s13   ;;  %s1672_s12 = sphi %s1717_s12, %s2040_s12  }
   0x7   : > { %p40_p0 = scmp.ne.s32.totalorder %s1676_s13, %s1672_s12  ;;  %p2025_p1 = scmp.eq.s32.totalorder %s1738_s16, 0 }
   0x8   : > { %p112_p3 = scmp.eq.s32.totalorder %s1050_s17, 2  ;;  %p1051_p5 = scmp.ge.s32.totalorder %s1684_s15, 1 }
   0x9   : > { %p1747_p4 = por %p2025_p1, %p40_p0  ;;  %p119_p7 = scmp.lt.s32.totalorder %s1684_s15, 4 }
   0xa   : > { %p1752_p6 = por %p112_p3, %p40_p0  ;;  %s1686_s21 = smov [#allocation5]  }
   0xb   : > { %s2028_s18 = scalar_select %p1747_p4, 1, 0 }
   0xc   : > { %s2029_s19 = scalar_select %p1752_p6, 1, 0 }
   0xd   : > { %p1757_p8 = pnand %p1051_p5, %p119_p7  ;;  %s131_s22 = sshll.u32 %s1686_s21, 4  ;;  %s132_s22 = int_to_ptr.vmem [resolvable:$true] %s131_s22 }
   0xe   : > { %s1687_s24 = smov [#allocation7]   ;;  %s1528_s28 = scalar_lea.hbm %s2022_s1, 6144 }
   0xf   : > { %s2030_s20 = scalar_select %p1757_p8, 1, 0 }
  0x10   : > { %p1466_p9 = pneg %p1757_p8  ;;  %s144_s25 = sshll.u32 %s1687_s24, 4  ;;  %s1769_s25 = int_to_ptr.vmem [resolvable:$true] %s144_s25 }
  0x11   : > { %p1529_p11 = scmp.ne.s32.totalorder %s2022_s1, %s1528_s28  ;;  %p1535_p3 = scmp.lt.u32.totalorder %s1528_s28, %s2022_s1 }
  0x12   : > { %p1765_p10 = pnand %p1466_p9, %p2025_p1 }
  0x14   : > { %p1530_p12 = pneg %p1765_p10 }
  0x16   : > { %p1531_p13 = pnand %p1530_p12, %p1529_p11 }
  0x18   : > { %p1532_p0 = pneg %p1531_p13 }
  0x1a   : > { %p1537_p5 = pnand %p1535_p3, %p1532_p0 }
  0x1c   : > { %1540 = shalt.err (!%p1537_p5)
}
  0x1d   : > { %s1541_s6 = scalar_lea.vmem %s132_s22, 6144  ;;  %p1549_p2 = scmp.lt.s32.totalorder %s132_s22, %s132_s22 }
  0x1e   : > { %p1542_p7 = scmp.ne.s32.totalorder %s132_s22, %s1541_s6  ;;  %p1550_p6 = scmp.lt.s32.totalorder %s1541_s6, %s1541_s6 }
  0x20   : > { %p1544_p9 = pnand %p1542_p7, %p1530_p12  ;;  %p1551_p4 = por %p1550_p6, %p1549_p2 }
  0x22   : > { %p1545_p1 = pneg %p1544_p9 }
  0x24   : > { %p1552_p8 = pnand %p1551_p4, %p1545_p1 }
  0x26   : > { %1555 = shalt.err (!%p1552_p8)
}
  0x27   : > { %s1688_s7 = smov 384   ;;  %s1689_s8 = smov 24  }
  0x28   : > { %1469 = dma.hbm_to_vmem [thread:$0]  (!%p1765_p10), %s2022_s1, 6144, %s132_s22, [#allocation6], %s1688_s7, %s1688_s7, %s1689_s8  }
  0x29   : > { %s1556_s21 = scalar_lea.hbm %s2023_s2, 6144 }
  0x2a   : > { %p1557_p11 = scmp.ne.s32.totalorder %s2023_s2, %s1556_s21  ;;  %p1563_p4 = scmp.lt.u32.totalorder %s1556_s21, %s2023_s2 }
  0x2c   : > { %p1559_p1 = pnand %p1557_p11, %p1530_p12 }
  0x2e   : > { %p1560_p2 = pneg %p1559_p1 }
  0x30   : > { %p1565_p6 = pnand %p1563_p4, %p1560_p2 }
  0x32   : > { %1568 = shalt.err (!%p1565_p6)
}
  0x33   : > { %s1569_s22 = scalar_lea.vmem %s1769_s25, 6144  ;;  %p1577_p3 = scmp.lt.s32.totalorder %s1769_s25, %s1769_s25 }
  0x34   : > { %p1570_p8 = scmp.ne.s32.totalorder %s1769_s25, %s1569_s22  ;;  %p1578_p5 = scmp.lt.s32.totalorder %s1569_s22, %s1569_s22 }
  0x36   : > { %p1572_p13 = pnand %p1570_p8, %p1530_p12  ;;  %p1579_p7 = por %p1578_p5, %p1577_p3 }
  0x38   : > { %p1573_p0 = pneg %p1572_p13 }
  0x3a   : > { %p1580_p9 = pnand %p1579_p7, %p1573_p0 }
  0x3c   : > { %1583 = shalt.err (!%p1580_p9)
}
  0x3d   : > { %s1690_s29 = smov 128   ;;  %s1691_s30 = smov 8  }
  0x3e   : > { %1472 = dma.hbm_to_vmem [thread:$0]  (!%p1765_p10), %s2023_s2, 6144, %s1769_s25, [#allocation6], %s1690_s29, %s1690_s29, %s1691_s30  }
  0x3f   : > { %s1822_s6 = sadd.s32 1, %s1684_s15   ;;  %s27_s8 = sadd.s32 1, %s1680_s14 }
  0x40   : > { %s24_s7 = ssub.s32 %s1684_s15, %s1822_s6  ;;  %p34_p11 = scmp.ne.s32.totalorder %s1680_s14, %s1676_s13 }
  0x41   : > { %p25_p12 = scmp.eq.s32.totalorder %s24_s7, 0  ;;  %p35_p1 = scmp.eq.s32.totalorder %s1684_s15, 0 }
  0x42   : > { %p2032_p4 = scmp.eq.s32.totalorder %s1738_s16, 2  ;;  %p1483_p8 = scmp.lt.s32.totalorder %s1684_s15, 3 }
  0x43   : > { %s1831_s9 = scalar_select %p25_p12, %s1680_s14, %s27_s8  }
  0x44   : > { %p36_p2 = por %p35_p1, %p34_p11  ;;  %p1835_p6 = por %p2032_p4, %p34_p11 }
  0x45   : > { %s158_s10 = sand.u32 1, %s1680_s14   ;;  %s1068_s25 = sshll.u32 %s1684_s15, 11 }
  0x46   : > { %s1055_s11 = sshll.u32 %s158_s10, 7  ;;  %s1845_s24 = scalar_lea.hbm %s2021_s0, %s1068_s25 }
  0x47   : > { %s162_s26 = scalar_lea.vmem [#allocation2], %s1055_s11  ;;  %p1849_p10 = pnand %p1483_p8, %p36_p2 }
  0x48   : > { %s169_s27 = sshll.u32 %s162_s26, 4  ;;  %s1853_s22 = scalar_lea.sflag [#allocation3], %s158_s10  ;;  %s1847_s27 = int_to_ptr.vmem [resolvable:$true] %s169_s27 }
  0x49   : > { %s1584_s4 = scalar_lea.hbm %s1845_s24, 2048  ;;  %p1586_p0 = pneg %p1849_p10 }
  0x4a   : > { %p1585_p13 = scmp.ne.s32.totalorder %s1845_s24, %s1584_s4  ;;  %s1589_s8 = scalar_lea.hbm %s2021_s0, 6144 }
  0x4b   : > { %p1590_p7 = scmp.lt.u32.totalorder %s1845_s24, %s2021_s0  ;;  %p1591_p9 = scmp.lt.u32.totalorder %s1589_s8, %s1584_s4 }
  0x4c   : > { %p1587_p3 = pnand %p1586_p0, %p1585_p13  ;;  %p1593_p11 = scmp.lt.u32.totalorder %s1584_s4, %s1845_s24 }
  0x4d   : > { %p1592_p12 = por %p1591_p9, %p1590_p7 }
  0x4e   : > { %p1588_p5 = pneg %p1587_p3 }
  0x4f   : > { %p1594_p1 = por %p1593_p11, %p1592_p12 }
  0x51   : > { %p1595_p2 = pnand %p1594_p1, %p1588_p5 }
  0x53   : > { %1598 = shalt.err (!%p1595_p2)
}
  0x54   : > { %s1599_s10 = scalar_lea.vmem %s1847_s27, 2048  ;;  %s1692_s17 = smov [#allocation2]  }
  0x55   : > { %p1600_p4 = scmp.ne.s32.totalorder %s1847_s27, %s1599_s10  ;;  %s1604_s21 = sshll.u32 %s1692_s17, 4  ;;  %s1605_s21 = int_to_ptr.vmem [resolvable:$false] %s1604_s21 }
  0x56   : > { %s1606_s26 = scalar_lea.vmem %s1605_s21, 4096  ;;  %p1607_p3 = scmp.lt.s32.totalorder %s1847_s27, %s1605_s21 }
  0x57   : > { %p1602_p8 = pnand %p1600_p4, %p1586_p0  ;;  %p1608_p7 = scmp.lt.s32.totalorder %s1606_s26, %s1599_s10 }
  0x59   : > { %p1603_p13 = pneg %p1602_p8  ;;  %p1609_p9 = por %p1608_p7, %p1607_p3 }
  0x5b   : > { %p1610_p12 = pnand %p1609_p9, %p1603_p13 }
  0x5d   : > { %1613 = shalt.err (!%p1610_p12)
}
  0x5e   : > { %1476 = dma.hbm_to_vmem [thread:$0]  (!%p1849_p10), %s1845_s24, 2048, %s1847_s27, %s1853_s22, %s1690_s29, %s1690_s29, %s1691_s30  }
  0x5f   : > { %p2035_p0 = scmp.ne.s32.totalorder %s2030_s20, 0 }
  0x60   : > { %s1887_s4 = sand.u32 (!%p2035_p0), 1, %s1676_s13   ;;  %p2036_p5 = scmp.ne.s32.totalorder (!%p2035_p0), %s2028_s18, 0 }
  0x61   : > { %181 = sbr.rel (%p2035_p0) target bundleno = 649 (0x289), region = 32  ;;  %s1059_s5 = sshll.u32 (!%p2035_p0), %s1887_s4, 7 }
  0x62   : > { %s184_s7 = scalar_lea.sflag (!%p2035_p0), [#allocation3], %s1887_s4  ;;  %s1893_s28 = scalar_lea.vmem (!%p2035_p0), [#allocation2], %s1059_s5 }
  0x68   : > { %1659 = dma.done.wait (%p2036_p5), %s184_s7, 2048  }
  0x69   : > { %1661 = vsyncadd (%p2036_p5), %s184_s7, 4294965248  ;;  %p2037_p10 = scmp.eq.s32.totalorder %s1738_s16, 0 }
  0x6b   : > { %1663 = dma.done.wait (%p2037_p10), [#allocation6], 12288   ;;  %p2038_p11 = pmov %p2037_p10 }
  0x6c   : > { %v1693_v0 = vmov 0.0   ;;  %v237_v1 = vld [vmem:[#allocation5 + $0x8] sm:$0xff]  ;;  %v240_v2 = vld [vmem:[#allocation5 + $0x20] sm:$0xff]  ;;  %v239_v5 = vld [vmem:[#allocation5 + $0x18] sm:$0xff]  ;;  %s1953_s18 = scalar_lea.vmem [#allocation8], %s1059_s5  ;;  %s1069_s20 = sshll.u32 %s1738_s16, 11 }
  0x6d   : > { %1665 = vsyncadd (%p2038_p11), [#allocation6], 4294955008  ;;  %348 = vmatprep.mubr.f32.mxu0 %v1693_v0  ;;  %v236_v3 = vld [vmem:[#allocation5] sm:$0xff]  ;;  %v1326_v4 = vpack.c.bf16 %v240_v2, %v237_v1  ;;  %v238_v6 = vld [vmem:[#allocation5 + $0x10] sm:$0xff]  ;;  %s958_s29 = sshll.u32 %s1953_s18, 4  ;;  %s1975_s27 = scalar_lea.hbm %s2024_s3, %s1069_s20  ;;  %s1977_s29 = int_to_ptr.vmem [resolvable:$true] %s958_s29 }
  0x6e   : > { %v241_v7 = vld [vmem:[#allocation5 + $0x28] sm:$0xff]  ;;  %v1328_v8 = vpack.c.bf16 %v239_v5, %v236_v3  ;;  %v243_v10 = vld [vmem:[#allocation5 + $0x38] sm:$0xff]  ;;  %v246_v11 = vld [vmem:[#allocation5 + $0x50] sm:$0xff]  ;;  %s945_s22 = scalar_lea.sflag [#allocation4], %s1887_s4  ;;  %s1614_s8 = scalar_lea.vmem %s1977_s29, 2048 }
  0x6f   : > { %v1358_v9 = vpack.c.bf16 %v241_v7, %v238_v6  ;;  %v242_v12 = vld [vmem:[#allocation5 + $0x30] sm:$0xff]  ;;  %1327 = vmatprep.subr.bf16.mxu0 %v1326_v4  ;;  %v1330_v13 = vpack.c.bf16 %v246_v11, %v243_v10  ;;  %v245_v14 = vld [vmem:[#allocation5 + $0x48] sm:$0xff]  ;;  %v244_v15 = vld [vmem:[#allocation5 + $0x40] sm:$0xff]  ;;  %p1615_p1 = scmp.ne.s32.totalorder %s1977_s29, %s1614_s8  ;;  %s1694_s16 = smov [#allocation8]  }
  0x70   : > { %v247_v16 = vld [vmem:[#allocation5 + $0x58] sm:$0xff]  ;;  %1329 = vmatpush1.bf16.msra.mxu0 %v1328_v8  ;;  %v1332_v17 = vpack.c.bf16 %v245_v14, %v242_v12  ;;  %v249_v19 = vld [vmem:[#allocation5 + $0x68] sm:$0xff]  ;;  %v252_v20 = vld [vmem:[#allocation5 + $0x80] sm:$0xff]  ;;  %s1618_s11 = sshll.u32 %s1694_s16, 4  ;;  %s1619_s11 = int_to_ptr.vmem [resolvable:$false] %s1618_s11 }
  0x71   : > { %1359 = vmatprep.subr.bf16.mxu1 %v1358_v9  ;;  %v1362_v18 = vpack.c.bf16 %v247_v16, %v244_v15  ;;  %v248_v21 = vld [vmem:[#allocation5 + $0x60] sm:$0xff]  ;;  %1331 = vmatprep.subr.bf16.mxu0 %v1330_v13  ;;  %v1334_v22 = vpack.c.bf16 %v252_v20, %v249_v19  ;;  %v251_v23 = vld [vmem:[#allocation5 + $0x78] sm:$0xff]  ;;  %v250_v24 = vld [vmem:[#allocation5 + $0x70] sm:$0xff]  ;;  %p1616_p2 = pnand %p1615_p1, %p1835_p6  ;;  %s1620_s25 = scalar_lea.vmem %s1619_s11, 4096 }
  0x72   : > { %1361 = vmatpush3.bf16.msra.mxu1 %v1358_v9  ;;  %v253_v25 = vld [vmem:[#allocation5 + $0x88] sm:$0xff]  ;;  %v255_v27 = vld [vmem:[#allocation5 + $0x98] sm:$0xff]  ;;  %v258_v28 = vld [vmem:[#allocation5 + $0xb0] sm:$0xff]  ;;  %v1336_v31 = vpack.c.bf16 %v251_v23, %v248_v21  ;;  %p1621_p8 = scmp.lt.s32.totalorder %s1977_s29, %s1619_s11  ;;  %p1622_p13 = scmp.lt.s32.totalorder %s1620_s25, %s1614_s8 }
  0x73   : > { %1363 = vmatprep.subr.bf16.mxu1 %v1362_v18  ;;  %v1366_v26 = vpack.c.bf16 %v253_v25, %v250_v24  ;;  %v256_v29 = vld [vmem:[#allocation5 + $0xa0] sm:$0xff]  ;;  %v259_v30 = vld [vmem:[#allocation5 + $0xb8] sm:$0xff]  ;;  %v1338_v32 = vpack.c.bf16 %v258_v28, %v255_v27  ;;  %v254_v33 = vld [vmem:[#allocation5 + $0x90] sm:$0xff]  ;;  %p1617_p4 = pneg %p1616_p2 }
  0x74   : > { %1333 = vmatpush1.bf16.msra.mxu0 %v1332_v17  ;;  %v257_v34 = vld [vmem:[#allocation5 + $0xa8] sm:$0xff]  ;;  %v1370_v35 = vpack.c.bf16 %v259_v30, %v256_v29  ;;  %v264_v37 = vld [vmem:[#allocation5 + $0xe0] sm:$0xff]  ;;  %v262_v38 = vld [vmem:[#allocation5 + $0xd0] sm:$0xff]  ;;  %p1623_p3 = por %p1622_p13, %p1621_p8 }
  0x75   : > { %1335 = vmatprep.subr.bf16.mxu0 %v1334_v22  ;;  %v261_v36 = vld [vmem:[#allocation5 + $0xc8] sm:$0xff]  ;;  %v1340_v40 = vpack.c.bf16 %v257_v34, %v254_v33  ;;  %v260_v42 = vld [vmem:[#allocation5 + $0xc0] sm:$0xff]  ;;  %v263_v43 = vld [vmem:[#allocation5 + $0xd8] sm:$0xff] }
  0x76   : > { %1365 = vmatpush3.bf16.msra.mxu1 %v1362_v18  ;;  %v265_v39 = vld [vmem:[#allocation5 + $0xe8] sm:$0xff]  ;;  %v1342_v41 = vpack.c.bf16 %v264_v37, %v261_v36  ;;  %v267_v45 = vld [vmem:[#allocation5 + $0xf8] sm:$0xff]  ;;  %v270_v46 = vld [vmem:[#allocation5 + $0x110] sm:$0xff]  ;;  %v1344_v49 = vpack.c.bf16 %v263_v43, %v260_v42  ;;  %p1624_p7 = pnand %p1623_p3, %p1617_p4 }
  0x77   : > { %1367 = vmatprep.subr.bf16.mxu1 %v1366_v26  ;;  %v1374_v44 = vpack.c.bf16 %v265_v39, %v262_v38  ;;  %v268_v47 = vld [vmem:[#allocation5 + $0x100] sm:$0xff]  ;;  %v271_v48 = vld [vmem:[#allocation5 + $0x118] sm:$0xff]  ;;  %v1346_v51 = vpack.c.bf16 %v270_v46, %v267_v45  ;;  %v266_v52 = vld [vmem:[#allocation5 + $0xf0] sm:$0xff] }
  0x78   : > { %1337 = vmatpush1.bf16.msra.mxu0 %v1336_v31  ;;  %v220_v50 = vld [vmem:[%s1893_s28] sm:$0xff]  ;;  %v269_v53 = vld [vmem:[#allocation5 + $0x108] sm:$0xff]  ;;  %v1378_v54 = vpack.c.bf16 %v271_v48, %v268_v47  ;;  %v274_v57 = vld [vmem:[#allocation5 + $0x130] sm:$0xff] }
  0x79   : > { %1339 = vmatprep.subr.bf16.mxu0 %v1338_v32  ;;  %v273_v55 = vld [vmem:[#allocation5 + $0x128] sm:$0xff]  ;;  %v276_v56 = vld [vmem:[#allocation5 + $0x140] sm:$0xff]  ;;  %1246 = vmatprep.mubr.f32.mxu1 %v220_v50  ;;  %v1348_v59 = vpack.c.bf16 %v269_v53, %v266_v52  ;;  %v275_v62 = vld [vmem:[#allocation5 + $0x138] sm:$0xff] }
  0x7a   : > { %1369 = vmatpush3.bf16.msra.mxu1 %v1366_v26  ;;  %v277_v58 = vld [vmem:[#allocation5 + $0x148] sm:$0xff]  ;;  %v1350_v60 = vpack.c.bf16 %v276_v56, %v273_v55  ;;  %v272_v61 = vld [vmem:[#allocation5 + $0x120] sm:$0xff]  ;;  %v279_v1 = vld [vmem:[#allocation5 + $0x158] sm:$0xff] }
  0x7b   : > { %1371 = vmatprep.subr.bf16.mxu1 %v1370_v35  ;;  %v1382_v63 = vpack.c.bf16 %v277_v58, %v274_v57  ;;  %v282_v2 = vld [vmem:[#allocation5 + $0x170] sm:$0xff]  ;;  %v280_v3 = vld [vmem:[#allocation5 + $0x160] sm:$0xff]  ;;  %v283_v4 = vld [vmem:[#allocation5 + $0x178] sm:$0xff]  ;;  %v1352_v5 = vpack.c.bf16 %v275_v62, %v272_v61 }
  0x7c   : > { %1341 = vmatpush1.bf16.msra.mxu0 %v1340_v40  ;;  %v1354_v6 = vpack.c.bf16 %v282_v2, %v279_v1  ;;  %v278_v7 = vld [vmem:[#allocation5 + $0x150] sm:$0xff]  ;;  %v281_v8 = vld [vmem:[#allocation5 + $0x168] sm:$0xff]  ;;  %v1386_v9 = vpack.c.bf16 %v283_v4, %v280_v3  ;;  %v622_v10 = vld [vmem:[#allocation7 + $0x100] sm:$0xff] }
  0x7d   : > { %1343 = vmatprep.subr.bf16.mxu0 %v1342_v41  ;;  %v623_v11 = vld [vmem:[#allocation7 + $0x108] sm:$0xff]  ;;  %v606_v12 = vld [vmem:[#allocation7 + $0x80] sm:$0xff]  ;;  %v1356_v14 = vpack.c.bf16 %v281_v8, %v278_v7  ;;  %v608_v19 = vld [vmem:[#allocation7 + $0x90] sm:$0xff] }
  0x7e   : > { %1373 = vmatpush3.bf16.msra.mxu1 %v1370_v35  ;;  %v607_v13 = vld [vmem:[#allocation7 + $0x88] sm:$0xff]  ;;  %v1422_v15 = vpack.c.bf16 %v623_v11, %v622_v10  ;;  %v590_v17 = vld [vmem:[#allocation7] sm:$0xff]  ;;  %v609_v20 = vld [vmem:[#allocation7 + $0x98] sm:$0xff] }
  0x7f   : > { %1375 = vmatprep.subr.bf16.mxu1 %v1374_v44  ;;  %v1390_v16 = vpack.c.bf16 %v607_v13, %v606_v12  ;;  %v591_v18 = vld [vmem:[#allocation7 + $0x8] sm:$0xff]  ;;  %v624_v21 = vld [vmem:[#allocation7 + $0x110] sm:$0xff]  ;;  %v625_v22 = vld [vmem:[#allocation7 + $0x118] sm:$0xff]  ;;  %v1394_v26 = vpack.c.bf16 %v609_v20, %v608_v19 }
  0x80   : > { %1345 = vmatpush1.bf16.msra.mxu0 %v1344_v49  ;;  %v221_v23 = vld [vmem:[%s1893_s28 + $0x8] sm:$0xff]  ;;  %v1392_v24 = vpack.c.bf16 %v591_v18, %v590_v17  ;;  %v222_v25 = vld [vmem:[%s1893_s28 + $0x10] sm:$0xff]  ;;  %v593_v28 = vld [vmem:[#allocation7 + $0x18] sm:$0xff]  ;;  %v1426_v29 = vpack.c.bf16 %v625_v22, %v624_v21 }
  0x81   : > { %1347 = vmatprep.subr.bf16.mxu0 %v1346_v51  ;;  %v592_v27 = vld [vmem:[#allocation7 + $0x10] sm:$0xff]  ;;  %v610_v30 = vld [vmem:[#allocation7 + $0xa0] sm:$0xff]  ;;  %v611_v31 = vld [vmem:[#allocation7 + $0xa8] sm:$0xff] }
  0x82   : > { %1377 = vmatpush3.bf16.msra.mxu1 %v1374_v44  ;;  %v626_v32 = vld [vmem:[#allocation7 + $0x120] sm:$0xff]  ;;  %v627_v33 = vld [vmem:[#allocation7 + $0x128] sm:$0xff]  ;;  %v223_v34 = vld [vmem:[%s1893_s28 + $0x18] sm:$0xff]  ;;  %v1396_v35 = vpack.c.bf16 %v593_v28, %v592_v27  ;;  %v1398_v37 = vpack.c.bf16 %v611_v31, %v610_v30 }
  0x83   : > { %1379 = vmatprep.subr.bf16.mxu1 %v1378_v54  ;;  %v224_v36 = vld [vmem:[%s1893_s28 + $0x20] sm:$0xff]  ;;  %v595_v39 = vld [vmem:[#allocation7 + $0x28] sm:$0xff]  ;;  %v1430_v40 = vpack.c.bf16 %v627_v33, %v626_v32  ;;  %v612_v41 = vld [vmem:[#allocation7 + $0xb0] sm:$0xff] }
  0x84   : > { %1349 = vmatpush1.bf16.msra.mxu0 %v1348_v59  ;;  %v594_v38 = vld [vmem:[#allocation7 + $0x20] sm:$0xff]  ;;  %v613_v42 = vld [vmem:[#allocation7 + $0xb8] sm:$0xff]  ;;  %v628_v43 = vld [vmem:[#allocation7 + $0x130] sm:$0xff] }
  0x85   : > { %1351 = vmatprep.subr.bf16.mxu0 %v1350_v60  ;;  %v629_v44 = vld [vmem:[#allocation7 + $0x138] sm:$0xff]  ;;  %v1912_v45 = vld [vmem:[%s1893_s28 + $0x28] sm:$0xff]  ;;  %v1400_v46 = vpack.c.bf16 %v595_v39, %v594_v38  ;;  %v1915_v47 = vld [vmem:[%s1893_s28 + $0x30] sm:$0xff]  ;;  %v1402_v48 = vpack.c.bf16 %v613_v42, %v612_v41 }
  0x86   : > { %1381 = vmatpush3.bf16.msra.mxu1 %v1378_v54  ;;  %v596_v49 = vld [vmem:[#allocation7 + $0x30] sm:$0xff]  ;;  %v1434_v51 = vpack.c.bf16 %v629_v44, %v628_v43  ;;  %v614_v52 = vld [vmem:[#allocation7 + $0xc0] sm:$0xff]  ;;  %v615_v53 = vld [vmem:[#allocation7 + $0xc8] sm:$0xff] }
  0x87   : > { %1383 = vmatprep.subr.bf16.mxu1 %v1382_v63  ;;  %v630_v54 = vld [vmem:[#allocation7 + $0x140] sm:$0xff]  ;;  %v631_v55 = vld [vmem:[#allocation7 + $0x148] sm:$0xff]  ;;  %v1921_v56 = vld [vmem:[%s1893_s28 + $0x38] sm:$0xff]  ;;  %v1406_v59 = vpack.c.bf16 %v615_v53, %v614_v52 }
  0x88   : > { %1353 = vmatpush1.bf16.msra.mxu0 %v1352_v5  ;;  %v1924_v58 = vld [vmem:[%s1893_s28 + $0x40] sm:$0xff]  ;;  %v599_v61 = vld [vmem:[#allocation7 + $0x48] sm:$0xff]  ;;  %v1438_v62 = vpack.c.bf16 %v631_v55, %v630_v54  ;;  %v617_v1 = vld [vmem:[#allocation7 + $0xd8] sm:$0xff] }
  0x89   : > { %1355 = vmatprep.subr.bf16.mxu0 %v1354_v6  ;;  %v598_v60 = vld [vmem:[#allocation7 + $0x40] sm:$0xff]  ;;  %v632_v2 = vld [vmem:[#allocation7 + $0x150] sm:$0xff]  ;;  %v633_v3 = vld [vmem:[#allocation7 + $0x158] sm:$0xff] }
  0x8a   : > { %1385 = vmatpush3.bf16.msra.mxu1 %v1382_v63  ;;  %v616_v63 = vld [vmem:[#allocation7 + $0xd0] sm:$0xff]  ;;  %v229_v4 = vld [vmem:[%s1893_s28 + $0x48] sm:$0xff]  ;;  %v1408_v5 = vpack.c.bf16 %v599_v61, %v598_v60  ;;  %v1442_v10 = vpack.c.bf16 %v633_v3, %v632_v2  ;;  %v618_v11 = vld [vmem:[#allocation7 + $0xe0] sm:$0xff] }
  0x8b   : > { %1387 = vmatprep.subr.bf16.mxu1 %v1386_v9  ;;  %v230_v6 = vld [vmem:[%s1893_s28 + $0x50] sm:$0xff]  ;;  %v1410_v7 = vpack.c.bf16 %v617_v1, %v616_v63  ;;  %v619_v12 = vld [vmem:[#allocation7 + $0xe8] sm:$0xff]  ;;  %v634_v13 = vld [vmem:[#allocation7 + $0x160] sm:$0xff] }
  0x8c   : > { %1357 = vmatpush1.bf16.msra.mxu0 %v1356_v14  ;;  %v600_v8 = vld [vmem:[#allocation7 + $0x50] sm:$0xff]  ;;  %v635_v14 = vld [vmem:[#allocation7 + $0x168] sm:$0xff]  ;;  %v232_v17 = vld [vmem:[%s1893_s28 + $0x60] sm:$0xff]  ;;  %v1414_v18 = vpack.c.bf16 %v619_v12, %v618_v11 }
  0x8d   : > { %1423 = vmatprep.subr.bf16.mxu0 %v1422_v15  ;;  %v602_v19 = vld [vmem:[#allocation7 + $0x60] sm:$0xff]  ;;  %v603_v20 = vld [vmem:[#allocation7 + $0x68] sm:$0xff]  ;;  %v1446_v21 = vpack.c.bf16 %v635_v14, %v634_v13  ;;  %v620_v22 = vld [vmem:[#allocation7 + $0xf0] sm:$0xff] }
  0x8e   : > { %1389 = vmatpush3.bf16.msra.mxu1 %v1386_v9  ;;  %v601_v9 = vld [vmem:[#allocation7 + $0x58] sm:$0xff]  ;;  %v604_v28 = vld [vmem:[#allocation7 + $0x70] sm:$0xff] }
  0x8f   : > { %1391 = vmatprep.subr.bf16.mxu1 %v1390_v16  ;;  %349 = vmatmul.mubr.f32.vlgmr.msra.gmra.mrb[0].mxu0 %v220_v50  ;;  %v597_v50 = vld [vmem:[#allocation7 + $0x38] sm:$0xff]  ;;  %v1412_v16 = vpack.c.bf16 %v601_v9, %v600_v8  ;;  %v636_v32 = vld [vmem:[#allocation7 + $0x170] sm:$0xff] }
  0x90   : > { %354 = vmatprep.mubr.f32.mxu0 %v1693_v0  ;;  %1425 = vmatpush3.bf16.msra.mxu0 %v1422_v15  ;;  %v1404_v57 = vpack.c.bf16 %v597_v50, %v596_v49  ;;  %v231_v15 = vld [vmem:[%s1893_s28 + $0x58] sm:$0xff] }
  0x91   : > { %1247 = vmatmul.mubr.f32.vlgmr.msra.gmra.mrb[0].mxu1 %v221_v23  ;;  %1427 = vmatprep.subr.bf16.mxu0 %v1426_v29  ;;  %v235_v30 = vld [vmem:[%s1893_s28 + $0x78] sm:$0xff] }
  0x92   : > { %1249 = vmatprep.mubr.f32.mxu1 %v222_v25  ;;  %1393 = vmatpush3.bf16.msra.mxu1 %v1392_v24  ;;  %v233_v24 = vld [vmem:[%s1893_s28 + $0x68] sm:$0xff]  ;;  %v637_v33 = vld [vmem:[#allocation7 + $0x178] sm:$0xff] }
  0x93   : > { %1395 = vmatprep.subr.bf16.mxu1 %v1394_v26  ;;  %355 = vmatmul.mubr.f32.gmra.mrb[2].mxu0 %v221_v23  ;;  %v621_v23 = vld [vmem:[#allocation7 + $0xf8] sm:$0xff]  ;;  %v234_v26 = vld [vmem:[%s1893_s28 + $0x70] sm:$0xff] }
  0x94   : > { %360 = vmatprep.mubr.f32.mxu0 %v1693_v0  ;;  %1429 = vmatpush3.bf16.msra.mxu0 %v1426_v29  ;;  %v1418_v27 = vpack.c.bf16 %v621_v23, %v620_v22  ;;  %v605_v29 = vld [vmem:[#allocation7 + $0x78] sm:$0xff] }
  0x95   : > { %1250 = vmatmul.mubr.f32.gmra.mrb[2].mxu1 %v223_v34  ;;  %1431 = vmatprep.subr.bf16.mxu0 %v1430_v40  ;;  %v1420_v31 = vpack.c.bf16 %v605_v29, %v604_v28 }
  0x96   : > { %1252 = vmatprep.mubr.f32.mxu1 %v224_v36  ;;  %1397 = vmatpush3.bf16.msra.mxu1 %v1396_v35 }
  0x97   : > { %1399 = vmatprep.subr.bf16.mxu1 %v1398_v37  ;;  %361 = vmatmul.mubr.f32.gmra.mrb[4].mxu0 %v222_v25  ;;  %v1416_v25 = vpack.c.bf16 %v603_v20, %v602_v19 }
  0x98   : > { %366 = vmatprep.mubr.f32.mxu0 %v1693_v0  ;;  %1433 = vmatpush3.bf16.msra.mxu0 %v1430_v40 }
  0x99   : > { %1253 = vmatmul.mubr.f32.gmra.mrb[4].mxu1 %v1912_v45  ;;  %1435 = vmatprep.subr.bf16.mxu0 %v1434_v51 }
  0x9a   : > { %1255 = vmatprep.mubr.f32.mxu1 %v1915_v47  ;;  %1401 = vmatpush3.bf16.msra.mxu1 %v1400_v46 }
  0x9b   : > { %1403 = vmatprep.subr.bf16.mxu1 %v1402_v48  ;;  %367 = vmatmul.mubr.f32.gmra.mrb[6].mxu0 %v223_v34  ;;  %v1450_v34 = vpack.c.bf16 %v637_v33, %v636_v32 }
  0x9c   : > { %372 = vmatprep.mubr.f32.mxu0 %v1693_v0  ;;  %1437 = vmatpush3.bf16.msra.mxu0 %v1434_v51 }
  0x9d   : > { %1256 = vmatmul.mubr.f32.gmra.mrb[6].mxu1 %v1921_v56  ;;  %1439 = vmatprep.subr.bf16.mxu0 %v1438_v62 }
  0x9e   : > { %1258 = vmatprep.mubr.f32.mxu1 %v1924_v58  ;;  %1405 = vmatpush3.bf16.msra.mxu1 %v1404_v57 }
  0x9f   : > { %1407 = vmatprep.subr.bf16.mxu1 %v1406_v59  ;;  %373 = vmatmul.mubr.f32.gmra.mrb[8].mxu0 %v224_v36 }
  0xa0   : > { %378 = vmatprep.mubr.f32.mxu0 %v1693_v0  ;;  %1441 = vmatpush3.bf16.msra.mxu0 %v1438_v62 }
  0xa1   : > { %1259 = vmatmul.mubr.f32.gmra.mrb[8].mxu1 %v229_v4  ;;  %1443 = vmatprep.subr.bf16.mxu0 %v1442_v10 }
  0xa2   : > { %1261 = vmatprep.mubr.f32.mxu1 %v230_v6  ;;  %1409 = vmatpush3.bf16.msra.mxu1 %v1408_v5 }
  0xa3   : > { %1411 = vmatprep.subr.bf16.mxu1 %v1410_v7  ;;  %379 = vmatmul.mubr.f32.gmra.mrb[10].mxu0 %v1912_v45 }
  0xa4   : > { %384 = vmatprep.mubr.f32.mxu0 %v1693_v0  ;;  %1445 = vmatpush3.bf16.msra.mxu0 %v1442_v10 }
  0xa5   : > { %1262 = vmatmul.mubr.f32.gmra.mrb[10].mxu1 %v231_v15  ;;  %1447 = vmatprep.subr.bf16.mxu0 %v1446_v21 }
  0xa6   : > { %1264 = vmatprep.mubr.f32.mxu1 %v232_v17  ;;  %1413 = vmatpush3.bf16.msra.mxu1 %v1412_v16 }
  0xa7   : > { %1415 = vmatprep.subr.bf16.mxu1 %v1414_v18  ;;  %385 = vmatmul.mubr.f32.gmra.mrb[12].mxu0 %v1915_v47 }
  0xa8   : > { %390 = vmatprep.mubr.f32.mxu0 %v1693_v0  ;;  %1449 = vmatpush3.bf16.msra.mxu0 %v1446_v21 }
  0xa9   : > { %1265 = vmatmul.mubr.f32.gmra.mrb[12].mxu1 %v233_v24  ;;  %1451 = vmatprep.subr.bf16.mxu0 %v1450_v34 }
  0xaa   : > { %1267 = vmatprep.mubr.f32.mxu1 %v234_v26  ;;  %1417 = vmatpush3.bf16.msra.mxu1 %v1416_v25 }
  0xab   : > { %1419 = vmatprep.subr.bf16.mxu1 %v1418_v27  ;;  %391 = vmatmul.mubr.f32.gmra.mrb[14].mxu0 %v1921_v56 }
  0xac   : > { %396 = vmatprep.mubr.f32.mxu0 %v1693_v0  ;;  %1453 = vmatpush3.bf16.msra.mxu0 %v1450_v34 }
  0xad   : > { %1268 = vmatmul.mubr.f32.gmra.mrb[14].mxu1 %v235_v30 }
  0xae   : > { %1421 = vmatpush3.bf16.msra.mxu1 %v1420_v31 }
  0xaf   : > { %397 = vmatmul.mubr.f32.gmra.mrb[16].mxu0 %v1924_v58 }
  0xb0   : > { %402 = vmatprep.mubr.f32.mxu0 %v1693_v0 }
  0xb3   : > { %403 = vmatmul.mubr.f32.gmra.mrb[18].mxu0 %v229_v4 }
  0xb4   : > { %408 = vmatprep.mubr.f32.mxu0 %v1693_v0 }
  0xb7   : > { %409 = vmatmul.mubr.f32.gmra.mrb[20].mxu0 %v230_v6 }
  0xb8   : > { %414 = vmatprep.mubr.f32.mxu0 %v1693_v0 }
  0xbb   : > { %415 = vmatmul.mubr.f32.gmra.mrb[22].mxu0 %v231_v15 }
  0xbc   : > { %420 = vmatprep.mubr.f32.mxu0 %v1693_v0 }
  0xbf   : > { %421 = vmatmul.mubr.f32.gmra.mrb[24].mxu0 %v232_v17 }
  0xc0   : > { %426 = vmatprep.mubr.f32.mxu0 %v1693_v0 }
  0xc3   : > { %427 = vmatmul.mubr.f32.gmra.mrb[26].mxu0 %v233_v24 }
  0xc4   : > { %432 = vmatprep.mubr.f32.mxu0 %v1693_v0 }
  0xc7   : > { %433 = vmatmul.mubr.f32.gmra.mrb[28].mxu0 %v234_v26 }
  0xc8   : > { %438 = vmatprep.mubr.f32.mxu0 %v1693_v0 }
  0xcb   : > { %439 = vmatmul.mubr.f32.gmra.mrb[30].mxu0 %v235_v30 }
 0x162   : > { %v350_v35 = vpop.f32.mrb[0].mxu0 }
 0x163   : > { %v352_v36 = vpop.f32.mrb[1].mxu0 }
 0x164   : > { %v1248_v37 = vpop.f32.mrb[0].mxu1  ;;  %702 = vmatprep.mubr.f32.mxu1 %v352_v36 }
 0x165   : > { %v511_v38 = vpop.f32.mrb[1].mxu1  ;;  %703 = vmatmul.mubr.f32.vlgmr.msra.gmra.mrb[16].mxu1 %v350_v35 }
 0x166   : > { %1302 = vmatprep.mubr.f32.mxu0 %v511_v38  ;;  %v356_v39 = vpop.f32.mrb[2].mxu0 }
 0x167   : > { %1303 = vmatmul.mubr.f32.vlgmr.msra.gmra.mrb[32].mxu0 %v1248_v37  ;;  %v358_v40 = vpop.f32.mrb[3].mxu0 }
 0x168   : > { %v1251_v41 = vpop.f32.mrb[2].mxu1  ;;  %707 = vmatprep.mubr.f32.mxu1 %v358_v40 }
 0x169   : > { %v521_v42 = vpop.f32.mrb[3].mxu1  ;;  %708 = vmatmul.mubr.f32.gmra.mrb[18].mxu1 %v356_v39 }
 0x16a   : > { %1305 = vmatprep.mubr.f32.mxu0 %v521_v42  ;;  %v362_v0 = vpop.f32.mrb[4].mxu0 }
 0x16b   : > { %1306 = vmatmul.mubr.f32.gmra.mrb[34].mxu0 %v1251_v41  ;;  %v364_v43 = vpop.f32.mrb[5].mxu0 }
 0x16c   : > { %v1254_v44 = vpop.f32.mrb[4].mxu1  ;;  %712 = vmatprep.mubr.f32.mxu1 %v364_v43 }
 0x16d   : > { %v531_v45 = vpop.f32.mrb[5].mxu1  ;;  %713 = vmatmul.mubr.f32.gmra.mrb[20].mxu1 %v362_v0 }
 0x16e   : > { %1308 = vmatprep.mubr.f32.mxu0 %v531_v45  ;;  %v368_v46 = vpop.f32.mrb[6].mxu0 }
 0x16f   : > { %1309 = vmatmul.mubr.f32.gmra.mrb[36].mxu0 %v1254_v44  ;;  %v370_v47 = vpop.f32.mrb[7].mxu0 }
 0x170   : > { %v1257_v48 = vpop.f32.mrb[6].mxu1  ;;  %717 = vmatprep.mubr.f32.mxu1 %v370_v47 }
 0x171   : > { %v541_v49 = vpop.f32.mrb[7].mxu1  ;;  %718 = vmatmul.mubr.f32.gmra.mrb[22].mxu1 %v368_v46 }
 0x172   : > { %1311 = vmatprep.mubr.f32.mxu0 %v541_v49  ;;  %v374_v50 = vpop.f32.mrb[8].mxu0 }
 0x173   : > { %1312 = vmatmul.mubr.f32.gmra.mrb[38].mxu0 %v1257_v48  ;;  %v376_v51 = vpop.f32.mrb[9].mxu0 }
 0x174   : > { %v1260_v52 = vpop.f32.mrb[8].mxu1  ;;  %722 = vmatprep.mubr.f32.mxu1 %v376_v51 }
 0x175   : > { %v551_v53 = vpop.f32.mrb[9].mxu1  ;;  %723 = vmatmul.mubr.f32.gmra.mrb[24].mxu1 %v374_v50 }
 0x176   : > { %1314 = vmatprep.mubr.f32.mxu0 %v551_v53  ;;  %v380_v54 = vpop.f32.mrb[10].mxu0 }
 0x177   : > { %1315 = vmatmul.mubr.f32.gmra.mrb[40].mxu0 %v1260_v52  ;;  %v382_v55 = vpop.f32.mrb[11].mxu0 }
 0x178   : > { %v1263_v56 = vpop.f32.mrb[10].mxu1  ;;  %727 = vmatprep.mubr.f32.mxu1 %v382_v55 }
 0x179   : > { %v561_v57 = vpop.f32.mrb[11].mxu1  ;;  %728 = vmatmul.mubr.f32.gmra.mrb[26].mxu1 %v380_v54 }
 0x17a   : > { %1317 = vmatprep.mubr.f32.mxu0 %v561_v57  ;;  %v386_v58 = vpop.f32.mrb[12].mxu0 }
 0x17b   : > { %1318 = vmatmul.mubr.f32.gmra.mrb[42].mxu0 %v1263_v56  ;;  %v388_v59 = vpop.f32.mrb[13].mxu0 }
 0x17c   : > { %v1266_v60 = vpop.f32.mrb[12].mxu1  ;;  %732 = vmatprep.mubr.f32.mxu1 %v388_v59 }
 0x17d   : > { %v571_v61 = vpop.f32.mrb[13].mxu1  ;;  %733 = vmatmul.mubr.f32.gmra.mrb[28].mxu1 %v386_v58 }
 0x17e   : > { %1320 = vmatprep.mubr.f32.mxu0 %v571_v61  ;;  %v392_v62 = vpop.f32.mrb[14].mxu0 }
 0x17f   : > { %1321 = vmatmul.mubr.f32.gmra.mrb[44].mxu0 %v1266_v60  ;;  %v394_v63 = vpop.f32.mrb[15].mxu0 }
 0x180   : > { %v1269_v1 = vpop.f32.mrb[14].mxu1  ;;  %737 = vmatprep.mubr.f32.mxu1 %v394_v63 }
 0x181   : > { %v581_v2 = vpop.f32.mrb[15].mxu1  ;;  %738 = vmatmul.mubr.f32.gmra.mrb[30].mxu1 %v392_v62 }
 0x182   : > { %1323 = vmatprep.mubr.f32.mxu0 %v581_v2  ;;  %v398_v3 = vpop.f32.mrb[16].mxu0 }
 0x183   : > { %1324 = vmatmul.mubr.f32.gmra.mrb[46].mxu0 %v1269_v1  ;;  %v400_v4 = vpop.f32.mrb[17].mxu0 }
 0x184   : > { %742 = vmatprep.mubr.f32.mxu1 %v400_v4 }
 0x185   : > { %743 = vmatmul.mubr.f32.gmra.mrb[32].mxu1 %v398_v3 }
 0x186   : > { %v404_v5 = vpop.f32.mrb[18].mxu0 }
 0x187   : > { %v406_v6 = vpop.f32.mrb[19].mxu0 }
 0x188   : > { %747 = vmatprep.mubr.f32.mxu1 %v406_v6 }
 0x189   : > { %748 = vmatmul.mubr.f32.gmra.mrb[34].mxu1 %v404_v5 }
 0x18a   : > { %v410_v7 = vpop.f32.mrb[20].mxu0 }
 0x18b   : > { %v412_v8 = vpop.f32.mrb[21].mxu0 }
 0x18c   : > { %752 = vmatprep.mubr.f32.mxu1 %v412_v8 }
 0x18d   : > { %753 = vmatmul.mubr.f32.gmra.mrb[36].mxu1 %v410_v7 }
 0x18e   : > { %v416_v9 = vpop.f32.mrb[22].mxu0 }
 0x18f   : > { %v418_v10 = vpop.f32.mrb[23].mxu0 }
 0x190   : > { %757 = vmatprep.mubr.f32.mxu1 %v418_v10 }
 0x191   : > { %758 = vmatmul.mubr.f32.gmra.mrb[38].mxu1 %v416_v9 }
 0x192   : > { %v422_v11 = vpop.f32.mrb[24].mxu0 }
 0x193   : > { %v424_v12 = vpop.f32.mrb[25].mxu0 }
 0x194   : > { %762 = vmatprep.mubr.f32.mxu1 %v424_v12 }
 0x195   : > { %763 = vmatmul.mubr.f32.gmra.mrb[40].mxu1 %v422_v11 }
 0x196   : > { %v428_v13 = vpop.f32.mrb[26].mxu0 }
 0x197   : > { %v430_v14 = vpop.f32.mrb[27].mxu0 }
 0x198   : > { %767 = vmatprep.mubr.f32.mxu1 %v430_v14 }
 0x199   : > { %768 = vmatmul.mubr.f32.gmra.mrb[42].mxu1 %v428_v13 }
 0x19a   : > { %v434_v15 = vpop.f32.mrb[28].mxu0 }
 0x19b   : > { %v436_v16 = vpop.f32.mrb[29].mxu0 }
 0x19c   : > { %772 = vmatprep.mubr.f32.mxu1 %v436_v16 }
 0x19d   : > { %773 = vmatmul.mubr.f32.gmra.mrb[44].mxu1 %v434_v15 }
 0x19e   : > { %v440_v17 = vpop.f32.mrb[30].mxu0 }
 0x19f   : > { %v442_v18 = vpop.f32.mrb[31].mxu0 }
 0x1a0   : > { %777 = vmatprep.mubr.f32.mxu1 %v442_v18 }
 0x1a1   : > { %778 = vmatmul.mubr.f32.gmra.mrb[46].mxu1 %v440_v17 }
 0x238   : > { %v1134_v19 = vpop.f32.mrb[16].mxu1 }
 0x239   : > { %v1135_v20 = vpop.f32.mrb[17].mxu1 }
 0x23a   : > { %v1304_v21 = vpop.f32.mrb[32].mxu0  ;;  %v1136_v22 = vadd.f32 %v1135_v20, %v1134_v19 }
 0x23b   : > { %v849_v23 = vpop.f32.mrb[33].mxu0 }
 0x23c   : > { %v850_v24 = vadd.f32 %v1136_v22, %v849_v23  ;;  %v1137_v25 = vpop.f32.mrb[18].mxu1 }
 0x23d   : > { %v1138_v26 = vpop.f32.mrb[19].mxu1 }
 0x23e   : > { %v1307_v27 = vpop.f32.mrb[34].mxu0  ;;  %928 = vst [vmem:[%s1953_s18] sm:$0xff] %v850_v24  ;;  %v1139_v28 = vadd.f32 %v1138_v26, %v1137_v25 }
 0x23f   : > { %v859_v29 = vpop.f32.mrb[35].mxu0 }
 0x240   : > { %v855_v30 = vadd.f32 %v1304_v21, %v1139_v28  ;;  %v1140_v31 = vpop.f32.mrb[20].mxu1 }
 0x241   : > { %v1141_v32 = vpop.f32.mrb[21].mxu1 }
 0x242   : > { %v1310_v33 = vpop.f32.mrb[36].mxu0  ;;  %929 = vst [vmem:[%s1953_s18 + $0x8] sm:$0xff] %v855_v30  ;;  %v1142_v34 = vadd.f32 %v1141_v32, %v1140_v31 }
 0x243   : > { %v869_v35 = vpop.f32.mrb[37].mxu0 }
 0x244   : > { %v860_v36 = vadd.f32 %v1142_v34, %v859_v29  ;;  %v1143_v37 = vpop.f32.mrb[22].mxu1 }
 0x245   : > { %v1144_v38 = vpop.f32.mrb[23].mxu1 }
 0x246   : > { %v1313_v39 = vpop.f32.mrb[38].mxu0  ;;  %930 = vst [vmem:[%s1953_s18 + $0x10] sm:$0xff] %v860_v36  ;;  %v1145_v40 = vadd.f32 %v1144_v38, %v1143_v37 }
 0x247   : > { %v879_v41 = vpop.f32.mrb[39].mxu0 }
 0x248   : > { %v865_v42 = vadd.f32 %v1307_v27, %v1145_v40  ;;  %v1146_v0 = vpop.f32.mrb[24].mxu1 }
 0x249   : > { %v1147_v43 = vpop.f32.mrb[25].mxu1 }
 0x24a   : > { %v1316_v44 = vpop.f32.mrb[40].mxu0  ;;  %931 = vst [vmem:[%s1953_s18 + $0x18] sm:$0xff] %v865_v42  ;;  %v1148_v45 = vadd.f32 %v1147_v43, %v1146_v0 }
 0x24b   : > { %v889_v46 = vpop.f32.mrb[41].mxu0 }
 0x24c   : > { %v870_v47 = vadd.f32 %v1148_v45, %v869_v35  ;;  %v1149_v48 = vpop.f32.mrb[26].mxu1 }
 0x24d   : > { %v1150_v49 = vpop.f32.mrb[27].mxu1 }
 0x24e   : > { %v1319_v50 = vpop.f32.mrb[42].mxu0  ;;  %932 = vst [vmem:[%s1953_s18 + $0x20] sm:$0xff] %v870_v47  ;;  %v1151_v51 = vadd.f32 %v1150_v49, %v1149_v48 }
 0x24f   : > { %v899_v52 = vpop.f32.mrb[43].mxu0 }
 0x250   : > { %v875_v53 = vadd.f32 %v1310_v33, %v1151_v51  ;;  %v1152_v54 = vpop.f32.mrb[28].mxu1 }
 0x251   : > { %v1153_v55 = vpop.f32.mrb[29].mxu1 }
 0x252   : > { %v1322_v56 = vpop.f32.mrb[44].mxu0  ;;  %933 = vst [vmem:[%s1953_s18 + $0x28] sm:$0xff] %v875_v53  ;;  %v1154_v57 = vadd.f32 %v1153_v55, %v1152_v54 }
 0x253   : > { %v909_v58 = vpop.f32.mrb[45].mxu0 }
 0x254   : > { %v880_v59 = vadd.f32 %v1154_v57, %v879_v41  ;;  %v1155_v60 = vpop.f32.mrb[30].mxu1 }
 0x255   : > { %v1156_v61 = vpop.f32.mrb[31].mxu1 }
 0x256   : > { %v1325_v62 = vpop.f32.mrb[46].mxu0  ;;  %934 = vst [vmem:[%s1953_s18 + $0x30] sm:$0xff] %v880_v59  ;;  %v1157_v63 = vadd.f32 %v1156_v61, %v1155_v60 }
 0x257   : > { %v919_v1 = vpop.f32.mrb[47].mxu0 }
 0x258   : > { %v885_v2 = vadd.f32 %v1313_v39, %v1157_v63  ;;  %v1158_v3 = vpop.f32.mrb[32].mxu1 }
 0x259   : > { %v1159_v4 = vpop.f32.mrb[33].mxu1 }
 0x25a   : > { %935 = vst [vmem:[%s1953_s18 + $0x38] sm:$0xff] %v885_v2  ;;  %v1160_v5 = vadd.f32 %v1159_v4, %v1158_v3 }
 0x25c   : > { %v890_v6 = vadd.f32 %v1160_v5, %v889_v46  ;;  %v1161_v7 = vpop.f32.mrb[34].mxu1 }
 0x25d   : > { %v1162_v8 = vpop.f32.mrb[35].mxu1 }
 0x25e   : > { %936 = vst [vmem:[%s1953_s18 + $0x40] sm:$0xff] %v890_v6  ;;  %v1163_v9 = vadd.f32 %v1162_v8, %v1161_v7 }
 0x260   : > { %v895_v10 = vadd.f32 %v1316_v44, %v1163_v9  ;;  %v1164_v11 = vpop.f32.mrb[36].mxu1 }
 0x261   : > { %v1165_v12 = vpop.f32.mrb[37].mxu1 }
 0x262   : > { %937 = vst [vmem:[%s1953_s18 + $0x48] sm:$0xff] %v895_v10  ;;  %v1166_v13 = vadd.f32 %v1165_v12, %v1164_v11 }
 0x264   : > { %v900_v14 = vadd.f32 %v1166_v13, %v899_v52  ;;  %v1167_v15 = vpop.f32.mrb[38].mxu1 }
 0x265   : > { %v1168_v16 = vpop.f32.mrb[39].mxu1 }
 0x266   : > { %938 = vst [vmem:[%s1953_s18 + $0x50] sm:$0xff] %v900_v14  ;;  %v1169_v17 = vadd.f32 %v1168_v16, %v1167_v15 }
 0x268   : > { %v905_v18 = vadd.f32 %v1319_v50, %v1169_v17  ;;  %v1170_v19 = vpop.f32.mrb[40].mxu1 }
 0x269   : > { %v1171_v20 = vpop.f32.mrb[41].mxu1 }
 0x26a   : > { %939 = vst [vmem:[%s1953_s18 + $0x58] sm:$0xff] %v905_v18  ;;  %v1172_v21 = vadd.f32 %v1171_v20, %v1170_v19 }
 0x26c   : > { %v910_v22 = vadd.f32 %v1172_v21, %v909_v58  ;;  %v1173_v23 = vpop.f32.mrb[42].mxu1 }
 0x26d   : > { %v1174_v24 = vpop.f32.mrb[43].mxu1 }
 0x26e   : > { %940 = vst [vmem:[%s1953_s18 + $0x60] sm:$0xff] %v910_v22  ;;  %v1175_v25 = vadd.f32 %v1174_v24, %v1173_v23 }
 0x270   : > { %v915_v26 = vadd.f32 %v1322_v56, %v1175_v25  ;;  %v1176_v27 = vpop.f32.mrb[44].mxu1 }
 0x271   : > { %v1177_v28 = vpop.f32.mrb[45].mxu1 }
 0x272   : > { %941 = vst [vmem:[%s1953_s18 + $0x68] sm:$0xff] %v915_v26  ;;  %v1178_v29 = vadd.f32 %v1177_v28, %v1176_v27 }
 0x274   : > { %v920_v30 = vadd.f32 %v1178_v29, %v919_v1  ;;  %v1179_v31 = vpop.f32.mrb[46].mxu1 }
 0x275   : > { %v1180_v32 = vpop.f32.mrb[47].mxu1 }
 0x276   : > { %942 = vst [vmem:[%s1953_s18 + $0x70] sm:$0xff] %v920_v30  ;;  %v1181_v33 = vadd.f32 %v1180_v32, %v1179_v31 }
 0x278   : > { %v925_v34 = vadd.f32 %v1325_v62, %v1181_v33 }
 0x27a   : > { %943 = vst [vmem:[%s1953_s18 + $0x78] sm:$0xff] %v925_v34 }
 0x27b   : > { %1627 = shalt.err (!%p1624_p7)
}
 0x27c   : > { %s1628_s10 = scalar_lea.hbm %s1975_s27, 2048  ;;  %s1632_s26 = scalar_lea.hbm %s2024_s3, 6144 }
 0x27d   : > { %p1629_p9 = scmp.ne.s32.totalorder %s1975_s27, %s1628_s10  ;;  %p1633_p5 = scmp.lt.u32.totalorder %s1975_s27, %s2024_s3 }
 0x27e   : > { %p1634_p10 = scmp.lt.u32.totalorder %s1632_s26, %s1628_s10  ;;  %p1636_p1 = scmp.lt.u32.totalorder %s1628_s10, %s1975_s27 }
 0x27f   : > { %p1630_p12 = pnand %p1629_p9, %p1835_p6 }
 0x280   : > { %p1635_p11 = por %p1634_p10, %p1633_p5 }
 0x281   : > { %p1631_p0 = pneg %p1630_p12 }
 0x282   : > { %p1637_p2 = por %p1636_p1, %p1635_p11 }
 0x284   : > { %p1638_p4 = pnand %p1637_p2, %p1631_p0 }
 0x286   : > { %1641 = shalt.err (!%p1638_p4)
}
 0x287   : > { %s1695_s28 = smov 128   ;;  %s1696_s18 = smov 8  }
 0x288   : > { %1464 = dma.vmem_to_hbm [thread:$0]  (%p1835_p6), %s1977_s29, 2048, %s1975_s27, %s945_s22, %s1695_s28, %s1695_s28, %s1696_s18  }
 0x289 PF: > { %p1486_p8 = scmp.ge.s32.totalorder %s1684_s15, 2  ;;  %s973_s20 = sand.u32 1, %s1672_s12  }
 0x28a   : > { %p2039_p13 = scmp.ne.s32.totalorder %s2029_s19, 0  ;;  %s974_s30 = scalar_lea.sflag [#allocation4], %s973_s20 }
 0x28c   : > { %p1478_p3 = pnand %p1486_p8, %p2039_p13 }
 0x28e   : > { %1667 = dma.done.wait (!%p1478_p3), %s974_s30, 2048  }
 0x28f   : > { %1669 = vsyncadd (!%p1478_p3), %s974_s30, 4294965248  ;;  %p17_p7 = scmp.ge.s32.totalorder %s1822_s6, 5   ;;  %s2040_s12 = smov %s1676_s13 }
 0x290   : > { %s2041_s13 = smov %s1680_s14  ;;  %s2042_s14 = smov %s1831_s9 }
 0x291   : > { %s2043_s15 = smov %s1822_s6  ;;  %19 = sbr.rel (!%p17_p7) target bundleno = 6 (0x6), region = 85 }
 0x298   :  { %979 = vsyncpa [#allocation3], 1 }
 0x299   :  { %981 = vsyncpa [#allocation3 + $0x1], 1 }
 0x29a   :  { %982 = vsyncpa [#allocation6], 1 }
 0x29b   :  { %983 = vsyncpa [#allocation4], 1 }
 0x29c   :  { %985 = vsyncpa [#allocation4 + $0x1], 1 }

</bundles_post_ra>
